<compile_context>
chip_gen: v5e
topology: v5e:2x2
jax: 0.10.0
libtpu: 0.0.40
codegen_flags: <defaults>
</compile_context>

<pallas_src>
import jax
import jax.numpy as jnp
from jax.experimental import pallas as pl
from jax.experimental.pallas import tpu as pltpu


_LANE = 128
_MAX_BLOCK_BYTES = 4 * 1024 * 1024     # per-operand block budget
_VMEM_LIMIT_BYTES = 32 * 1024 * 1024   # explicit scoped-VMEM limit (safe on all chips)


# ------------------------------ tiling helpers ------------------------------ #

def _sublane_quantum(itemsize):
    # Packed (8,128) tile is per-32-bit: f32 -> 8, bf16 -> 16, int8/fp8 -> 32.
    return max(8, 32 // itemsize)


def _pick_block(rows, cols, itemsize, max_block_bytes=_MAX_BLOCK_BYTES):
    """Lane-dense, (sub,128)-aligned (tm, tn) block of <= max_block_bytes.

    Block dims never need to divide the array dims: callers use pl.cdiv grids
    and rely on Pallas partial edge blocks (no whole-tensor padding).
    """
    sub = _sublane_quantum(itemsize)
    max_elems = max(max_block_bytes // itemsize, sub * _LANE)

    if cols <= _LANE:
        tn = cols                                          # full (narrow) lane extent
    else:
        tn = min(pl.cdiv(cols, _LANE) * _LANE,
                 (max_elems // sub) // _LANE * _LANE)

    if rows <= sub:
        tm = rows                                          # full sublane extent
    else:
        tm = max((max_elems // tn) // sub * sub, sub)
        tm = min(tm, pl.cdiv(rows, sub) * sub)
    return tm, tn


def _split_for_megacore(rows, cols, tm, tn, itemsize):
    """Guarantee >=2 grid blocks along a parallel axis so both v7x TCs get work."""
    if pl.cdiv(rows, tm) * pl.cdiv(cols, tn) >= 2:
        return tm, tn
    sub = _sublane_quantum(itemsize)
    if rows >= 2 * sub:
        tm = pl.cdiv(pl.cdiv(rows, 2), sub) * sub
    elif cols > _LANE:
        tn = pl.cdiv(pl.cdiv(cols, 2), _LANE) * _LANE
    return tm, tn


def _lane_dense_2d(n):
    """Widest (rows, cols) factorization of n with cols a multiple of 128,
    preferring >=8 rows so blocks use all sublanes. None if n % 128 != 0."""
    best = None
    for w in (8192, 4096, 2048, 1024, 512, 256, 128):
        if n % w == 0:
            if best is None:
                best = (n // w, w)
            if n // w >= 8:
                return n // w, w
    return best


# ------------------- fused residual + generic elementwise fn ---------------- #

def _make_residual_elementwise_kernel(fn):
    def kernel(x_ref, o_ref):
        x = x_ref[...]
        o_ref[...] = (x + fn(x)).astype(o_ref.dtype)   # fn applied on the VMEM tile
    return kernel


def residual_elementwise(x, fn):
    """out = x + fn(x) for a pointwise, shape/dtype-preserving fn, fused into
    a single Pallas pass (one HBM read of x, one HBM write of out)."""
    shape, dtype, n = x.shape, x.dtype, x.size
    itemsize = dtype.itemsize

    view = _lane_dense_2d(n)
    if view is None:
        # Ragged total size (n % 128 != 0): padding would cost an extra HBM
        # pass, and XLA fuses the elementwise fn + add into one pass anyway.
        return x + fn(x)
    rows, cols = view

    x2 = x.reshape(rows, cols)                         # free for contiguous arrays
    tm, tn = _pick_block(rows, cols, itemsize)
    tm, tn = _split_for_megacore(rows, cols, tm, tn, itemsize)
    grid = (pl.cdiv(rows, tm), pl.cdiv(cols, tn))

    out2 = pl.pallas_call(
        _make_residual_elementwise_kernel(fn),
        out_shape=jax.ShapeDtypeStruct((rows, cols), dtype),
        grid_spec=pltpu.PrefetchScalarGridSpec(
            num_scalar_prefetch=0,
            grid=grid,
            in_specs=[pl.BlockSpec((tm, tn), lambda i, j: (i, j))],
            out_specs=pl.BlockSpec((tm, tn), lambda i, j: (i, j)),
        ),
        compiler_params=pltpu.CompilerParams(
            dimension_semantics=("parallel", "parallel"),
            vmem_limit_bytes=_VMEM_LIMIT_BYTES),
        cost_estimate=pl.CostEstimate(                 # advisory (fn-dependent)
            flops=2 * n, transcendentals=0, bytes_accessed=2 * n * itemsize),
    )(x2)
    return out2.reshape(shape)


# --------------------- fused residual + per-channel affine ------------------ #

def _residual_affine_kernel(x_ref, s1_ref, b_ref, o_ref):
    # Residual folded into the scale: out = x*(1+scale[c]) + shift[c], f32 math.
    o_ref[...] = (x_ref[...] * s1_ref[...] + b_ref[...]).astype(o_ref.dtype)


def residual_channel_affine(x, scale, shift):
    """out = x + (x*scale[c] + shift[c]) for NCHW x, one fused HBM pass."""
    N, C, H, W = x.shape
    rows, cols = N * C, H * W
    dtype = x.dtype
    itemsize = dtype.itemsize

    x2 = x.reshape(rows, cols)                         # lane-dense view, row = (n, c)
    # Per-row (= per (n, c)) params, kept in f32 so bf16 x still gets an f32
    # multiply-add; the "+1" residual fold happens on this tiny vector only.
    s1 = jnp.tile(1.0 + scale.astype(jnp.float32), N).reshape(rows, 1)
    b1 = jnp.tile(shift.astype(jnp.float32), N).reshape(rows, 1)

    tm, tn = _pick_block(rows, cols, itemsize)
    tm, tn = _split_for_megacore(rows, cols, tm, tn, itemsize)
    grid = (pl.cdiv(rows, tm), pl.cdiv(cols, tn))

    out2 = pl.pallas_call(
        _residual_affine_kernel,
        out_shape=jax.ShapeDtypeStruct((rows, cols), dtype),
        grid_spec=pltpu.PrefetchScalarGridSpec(
            num_scalar_prefetch=0,
            grid=grid,
            in_specs=[
                pl.BlockSpec((tm, tn), lambda i, j: (i, j)),
                pl.BlockSpec((tm, 1), lambda i, j: (i, 0)),
                pl.BlockSpec((tm, 1), lambda i, j: (i, 0)),
            ],
            out_specs=pl.BlockSpec((tm, tn), lambda i, j: (i, j)),
        ),
        compiler_params=pltpu.CompilerParams(
            dimension_semantics=("parallel", "parallel"),
            vmem_limit_bytes=_VMEM_LIMIT_BYTES),
        cost_estimate=pl.CostEstimate(
            flops=2 * x.size, transcendentals=0,
            bytes_accessed=2 * x.size * itemsize + 8 * rows),
    )(x2, s1, b1)
    return out2.reshape(N, C, H, W)


# -------------------------------- module port ------------------------------- #

class ChannelAffine:
    """Per-channel affine fn(x) = x*scale[c] + shift[c] for NCHW x (stand-in
    for an elementwise UNet block); Residual fuses it into one Pallas pass."""

    def __init__(self, scale, shift):
        self.scale = scale
        self.shift = shift

    def __call__(self, x):
        return x * self.scale[None, :, None, None] + self.shift[None, :, None, None]


class Residual:
    """JAX/Pallas port of the PyTorch `Residual` wrapper.

    forward(x, *args, **kwargs) = x + fn(x, *args, **kwargs)

      * fn is a ChannelAffine              -> fused Pallas kernel (folded affine).
      * elementwise=True (pointwise,
        shape/dtype-preserving fn)         -> fused Pallas kernel; fn traced on
                                              the VMEM tile (1 HBM read + 1 write).
      * anything else                      -> plain JAX `x + fn(x, ...)`; XLA
                                              fuses the add, so a standalone
                                              Pallas add would only add traffic.
    """

    def __init__(self, fn, elementwise=False):
        self.fn = fn
        self.elementwise = elementwise

    def __call__(self, x, *args, **kwargs):
        if not args and not kwargs:
            if isinstance(self.fn, ChannelAffine) and x.ndim == 4:
                return residual_channel_affine(x, self.fn.scale, self.fn.shift)
            if self.elementwise:
                return residual_elementwise(x, self.fn)
        # TODO(synk): non-elementwise fns (convs, attention blocks) have no
        # clean in-kernel equivalent here; the residual add is left to XLA.
        return x + self.fn(x, *args, **kwargs)


# ----------------------------------- demo ----------------------------------- #

if __name__ == "__main__":
    key = jax.random.PRNGKey(0)
    k_x, k_w, k_b = jax.random.split(key, 3)

    B, C, H, W = 2, 4, 16, 16               # NCHW, like the PyTorch module's inputs
    x = jax.random.normal(k_x, (B, C, H, W), dtype=jnp.float32)
    scale = jax.random.normal(k_w, (C,), dtype=jnp.float32) * 0.1
    shift = jax.random.normal(k_b, (C,), dtype=jnp.float32) * 0.1

    # 1) fused per-channel-affine path (residual folded into the scale)
    res_affine = Residual(ChannelAffine(scale, shift))
    out_affine = jax.block_until_ready(res_affine(x))
    ref_affine = x + (x * scale[None, :, None, None] + shift[None, :, None, None])
    assert out_affine.shape == x.shape and out_affine.dtype == x.dtype
    assert jnp.allclose(out_affine, ref_affine, atol=1e-6, rtol=1e-6), "affine path mismatch"

    # 2) fused generic elementwise path (fn traced inside the kernel), f32
    res_gelu = Residual(jax.nn.gelu, elementwise=True)
    out_gelu = jax.block_until_ready(res_gelu(x))
    ref_gelu = x + jax.nn.gelu(x)
    assert out_gelu.shape == x.shape and out_gelu.dtype == x.dtype
    assert jnp.allclose(out_gelu, ref_gelu, atol=1e-5, rtol=1e-5), "gelu path mismatch"

    # 3) same fused path with bf16 activations (dtype-aware sublane tiling)
    x_bf16 = x.astype(jnp.bfloat16)
    out_bf16 = jax.block_until_ready(res_gelu(x_bf16))
    ref_bf16 = (x_bf16 + jax.nn.gelu(x_bf16)).astype(jnp.float32)
    assert out_bf16.shape == x_bf16.shape and out_bf16.dtype == jnp.bfloat16
    assert jnp.allclose(out_bf16.astype(jnp.float32), ref_bf16, atol=5e-2, rtol=5e-2), \
        "bf16 path mismatch"

    # 4) unfused fallback (fn not marked elementwise) stays plain JAX
    res_plain = Residual(jax.nn.silu)
    out_plain = jax.block_until_ready(res_plain(x))
    assert jnp.allclose(out_plain, x + jax.nn.silu(x), atol=1e-6, rtol=1e-6), \
        "fallback path mismatch"

    print("KERNEL_OK")
</pallas_src>

<mosaic_0001>
module attributes {stable_mosaic.version = 11 : i64} {
  func.func @_residual_affine_kernel(%arg0: i32, %arg1: i32, %arg2: memref<8x128xf32, #tpu.memory_space<vmem>>, %arg3: memref<8x1xf32, #tpu.memory_space<vmem>>, %arg4: memref<8x1xf32, #tpu.memory_space<vmem>>, %arg5: memref<8x128xf32, #tpu.memory_space<vmem>>) attributes {dimension_semantics = [#tpu.dimension_semantics<parallel>, #tpu.dimension_semantics<parallel>], iteration_bounds = array<i64: 1, 2>, scalar_prefetch = 0 : i64, scratch_operands = 0 : i64, tpu.core_type = #tpu.core_type<tc>, window_params = [{transform_indices = @transform_0, window_bounds = array<i64: 8, 128>}, {transform_indices = @transform_1, window_bounds = array<i64: 8, 1>}, {transform_indices = @transform_2, window_bounds = array<i64: 8, 1>}, {transform_indices = @transform_3, window_bounds = array<i64: 8, 128>}]} {
    %c0 = arith.constant 0 : index
    %c0_0 = arith.constant 0 : index
    %0 = vector.load %arg2[%c0, %c0_0] : memref<8x128xf32, #tpu.memory_space<vmem>>, vector<8x128xf32>
    %c0_1 = arith.constant 0 : index
    %c0_2 = arith.constant 0 : index
    %1 = vector.load %arg3[%c0_1, %c0_2] : memref<8x1xf32, #tpu.memory_space<vmem>>, vector<8x1xf32>
    %2 = vector.broadcast %1 : vector<8x1xf32> to vector<8x128xf32>
    %3 = arith.mulf %0, %2 : vector<8x128xf32>
    %c0_3 = arith.constant 0 : index
    %c0_4 = arith.constant 0 : index
    %4 = vector.load %arg4[%c0_3, %c0_4] : memref<8x1xf32, #tpu.memory_space<vmem>>, vector<8x1xf32>
    %5 = vector.broadcast %4 : vector<8x1xf32> to vector<8x128xf32>
    %6 = arith.addf %3, %5 : vector<8x128xf32>
    %c0_5 = arith.constant 0 : index
    %c0_6 = arith.constant 0 : index
    %7 = vector.load %arg5[%c0_5, %c0_6] : memref<8x128xf32, #tpu.memory_space<vmem>>, vector<8x128xf32>
    tpu.vector_store %arg5[%c0_5, %c0_6], %6 {strides = array<i32>} : memref<8x128xf32, #tpu.memory_space<vmem>>, vector<8x128xf32>,
    return
  }
  func.func @transform_0(%arg0: i32, %arg1: i32) -> (i32, i32) {
    %c0_i32 = arith.constant 0 : i32
    return %arg0, %arg1 : i32, i32
  }
  func.func @transform_1(%arg0: i32, %arg1: i32) -> (i32, i32) {
    %c0_i32 = arith.constant 0 : i32
    %c0_i32_0 = arith.constant 0 : i32
    return %arg0, %c0_i32 : i32, i32
  }
  func.func @transform_2(%arg0: i32, %arg1: i32) -> (i32, i32) {
    %c0_i32 = arith.constant 0 : i32
    %c0_i32_0 = arith.constant 0 : i32
    return %arg0, %c0_i32 : i32, i32
  }
  func.func @transform_3(%arg0: i32, %arg1: i32) -> (i32, i32) {
    %c0_i32 = arith.constant 0 : i32
    return %arg0, %arg1 : i32, i32
  }
}

</mosaic_0001>

<bundles_post_ra>
// kernel: tpu_custom_call.1
= control target key start
LH: loop header
LB: loop body
LE: loop exit
PB: predicated region body
PF: predicated region fallthrough
CT: control target
= control target key end

     0   :  { %8 = vsyncpa [#allocation3], 0  ;;  %s641_s0 = inlined_call_operand.vmem [shape: f32[8,256], index: 0, kind: input, shape index: {}]   ;;  %s642_s1 = inlined_call_operand.vmem [shape: f32[8,1], index: 1, kind: input, shape index: {}]   ;;  %s643_s2 = inlined_call_operand.vmem [shape: f32[8,1], index: 2, kind: input, shape index: {}]   ;;  %s644_s3 = inlined_call_operand.hbm [shape: f32[8,256], index: 3, kind: output, shape index: {}]  }
   0x1   :  { %10 = vsyncpa [#allocation3 + $0x1], 0  ;;  %s538_s12 = smov 0   ;;  %s540_s13 = smov 0  }
   0x2   :  { %s542_s14 = smov 0   ;;  %s544_s15 = smov 0  }
   0x3   :  { %s546_s16 = smov 0   ;;  %s548_s17 = smov 0  }
   0x4 LB: > { %s367_s18 = sadd.s32 4294967295, %s515_s17   ;;  %s368_s19 = sadd.s32 4294967294, %s515_s17   ;;  %s515_s17 = sphi %s548_s17, %s16_s17   ;;  %s511_s16 = sphi %s546_s16, %s651_s16   ;;  %s507_s15 = sphi %s544_s15, %s650_s15   ;;  %s503_s14 = sphi %s542_s14, %s649_s14   ;;  %s499_s13 = sphi %s540_s13, %s648_s13   ;;  %s495_s12 = sphi %s538_s12, %s647_s12  }
   0x5   : > { %s25_s20 = sadd.s32 1, %s511_s16  ;;  %s117_s21 = sadd.s32 1, %s503_s14 }
   0x6   : > { %p26_p0 = scmp.ge.s32.totalorder %s25_s20, 2  ;;  %p127_p1 = scmp.ne.s32.totalorder %s503_s14, %s499_s13 }
   0x7   : > { %p128_p2 = scmp.eq.s32.totalorder %s367_s18, 1  ;;  %p133_p3 = scmp.ne.s32.totalorder %s499_s13, %s495_s12 }
   0x8   : > { %s653_s20 = smov (%p26_p0, %s25_s20), 0  ;;  %p134_p5 = scmp.eq.s32.totalorder %s368_s19, 1 }
   0x9   : > { %p578_p4 = por %p128_p2, %p127_p1  ;;  %s113_s23 = ssub.s32 %s511_s16, %s653_s20 }
   0xa   : > { %p373_p6 = scmp.ge.s32.totalorder %s515_s17, 1  ;;  %p115_p7 = scmp.eq.s32.totalorder %s113_s23, 0 }
   0xb   : > { %p585_p8 = por %p134_p5, %p133_p3  ;;  %p177_p9 = scmp.lt.s32.totalorder %s515_s17, 3 }
   0xc   : > { %s591_s25 = scalar_select %p115_p7, %s503_s14, %s117_s21  }
   0xd   : > { %p178_p10 = pnand %p373_p6, %p177_p9 }
   0xe   : > { %p214_p11 = scmp.lt.s32.totalorder (!%p178_p10), %s507_s15, 1  ;;  %s209_s4 = sand.u32 (!%p178_p10), 1, %s499_s13  }
   0xf   : > { %181 = sbr.rel (%p178_p10) target bundleno = 150 (0x96), region = 32  ;;  %s374_s6 = sshll.u32 (!%p178_p10), %s209_s4, 3 }
  0x10   : > { %s377_s7 = sshll.u32 (!%p178_p10), %s507_s15, 3  ;;  %s211_s21 = scalar_lea.vmem (!%p178_p10), [#allocation2], %s374_s6 }
  0x11   : > { %s257_s19 = scalar_lea.hbm (!%p178_p10), %s644_s3, %s377_s7  ;;  %s259_s23 = sshll.u32 (!%p178_p10), %s211_s21, 4  ;;  %s260_s23 = int_to_ptr.vmem [resolvable:$true] %s259_s23 }
  0x12   : > { %s261_s26 = sshll.u32 (!%p178_p10), %s257_s19, 4  ;;  %s262_s26 = int_to_ptr.hbm [resolvable:$true] %s261_s26 }
  0x13   : > { %s451_s27 = sshra.s32 (!%p178_p10), %s262_s26, 4  ;;  %s452_s27 = int_to_ptr.hbm [resolvable:$true] %s451_s27 }
  0x14   : > { %v229_v0 = vld [vmem:[%s642_s1] sm:$0xff]  ;;  %v517_v1 = vmov 0   ;;  %s215_s30 = scalar_select %p214_p11, %s507_s15, 1 }
  0x15   : > { %436 = vset.pattern.permute.xlu0 %v517_v1  ;;  %v236_v2 = vld [vmem:[%s643_s2] sm:$0xff]  ;;  %s245_s15 = scalar_lea.sflag [#allocation3], %s209_s4  ;;  %s453_s28 = scalar_lea.hbm %s452_s27, 8 }
  0x16   : > { %232 = vperm.xlu0 %436, %v229_v0   ;;  %s375_s5 = sshll.u32 %s215_s30, 3  ;;  %p454_p12 = scmp.ne.s32.totalorder %s452_s27, %s453_s28 }
  0x17   : > { %s219_s10 = scalar_lea.vmem %s641_s0, %s375_s5  ;;  %s457_s5 = scalar_lea.hbm %s644_s3, 16 }
  0x18   : > { %v228_v4 = vld [vmem:[%s219_s10] sm:$0xff]  ;;  %p455_p13 = pnand %p454_p12, %p578_p4  ;;  %p458_p1 = scmp.lt.s32.totalorder %s452_s27, %s644_s3 }
  0x19   : > { %p459_p2 = scmp.lt.s32.totalorder %s457_s5, %s453_s28 }
  0x1a   : > { %p456_p0 = pneg %p455_p13 }
  0x1b   : > { %p460_p3 = por %p459_p2, %p458_p1 }
  0x1d   : > { %p461_p5 = pnand %p460_p3, %p456_p0 }
  0x1e   : > { %239 = vperm.xlu0 %436, %v236_v2  }
  0x88   : > { %v233_v3 = vpop.permute.xlu0 %232 }
  0x89   : > { %v235_v5 = vmul.f32 %v233_v3, %v228_v4 }
  0x90   : > { %v240_v6 = vpop.permute.xlu0 %239 }
  0x91   : > { %v242_v7 = vadd.f32 %v240_v6, %v235_v5 }
  0x93   : > { %243 = vst [vmem:[%s211_s21] sm:$0xff] %v242_v7 }
  0x94   : > { %464 = shalt.err (!%p461_p5)
}
  0x95   : > { %380 = dma.vmem_to_hbm [thread:$0]  (%p578_p4), %s260_s23, 128, %s262_s26, %s245_s15  }
  0x96 PF: > { %p386_p6 = scmp.ge.s32.totalorder %s515_s17, 2  ;;  %s273_s4 = sand.u32 1, %s495_s12  }
  0x97   : > { %s274_s8 = scalar_lea.sflag [#allocation3], %s273_s4 }
  0x98   : > { %p383_p7 = pnand %p386_p6, %p585_p8 }
  0x9a   : > { %p384_p9 = pneg %p383_p7 }
  0x9c   : > { %490 = dma.done.wait (%p384_p9), %s274_s8, 128  }
  0x9d   : > { %492 = vsyncadd (%p384_p9), %s274_s8, 4294967168  ;;  %s16_s17 = sadd.s32 1, %s515_s17   ;;  %s647_s12 = smov %s499_s13 }
  0x9e   : > { %p13_p10 = scmp.ge.s32.totalorder %s16_s17, 4   ;;  %s648_s13 = smov %s503_s14 }
  0x9f   : > { %s649_s14 = smov %s591_s25  ;;  %s650_s15 = smov %s511_s16 }
  0xa0   : > { %s651_s16 = smov %s653_s20  ;;  %15 = sbr.rel (!%p13_p10) target bundleno = 4 (0x4), region = 73 }
  0xa5   :  { %280 = vsyncpa [#allocation3], 1 }
  0xa6   :  { %282 = vsyncpa [#allocation3 + $0x1], 1 }

</bundles_post_ra>
